<compile_context>
chip_gen: v7x
topology: tpu7x:2x2x1
jax: 0.10.0
libtpu: 0.0.40
codegen_flags: <defaults>
</compile_context>

<pallas_src>
import jax
import jax.numpy as jnp
from jax.experimental import pallas as pl
from jax.experimental.pallas import tpu as pltpu


_MIB = 1024 * 1024


# ----------------------------------------------------------------------------
# Kernels
# ----------------------------------------------------------------------------
def _conv1x1_kernel(w_ref, b_ref, x_ref, o_ref):
    # w_ref: (C_out, C_in) resident weight (constant block index across grid).
    # b_ref: (C_out, 1) bias (zeros when the module has bias=False).
    # x_ref: (C_in, TL) activation tile -- H*W on lanes.
    # o_ref: (C_out, TL) output tile -- lane-dense stores.
    acc = jnp.dot(w_ref[...], x_ref[...], preferred_element_type=jnp.float32)
    o_ref[...] = (acc + b_ref[...].astype(jnp.float32)).astype(o_ref.dtype)


def _conv1x1_tiled_kernel(w_ref, b_ref, x_ref, o_ref, acc_ref):
    # Large-channel path: grid = (N, C_out tiles, lane tiles, C_in tiles),
    # reduction (C_in) axis last / "arbitrary", f32 accumulator in VMEM.
    kk = pl.program_id(3)

    @pl.when(kk == 0)
    def _():
        acc_ref[...] = jnp.zeros_like(acc_ref)

    acc_ref[...] += jnp.dot(
        w_ref[...], x_ref[...], preferred_element_type=jnp.float32
    )

    @pl.when(kk == pl.num_programs(3) - 1)
    def _():
        o_ref[...] = (
            acc_ref[...] + b_ref[...].astype(jnp.float32)
        ).astype(o_ref.dtype)


# ----------------------------------------------------------------------------
# Tiling helpers
# ----------------------------------------------------------------------------
def _vmem_budget_bytes():
    """Generation-aware VMEM budget: ~70% of per-core VMEM capacity."""
    try:
        cap = int(pltpu.get_tpu_info().vmem_capacity_bytes)
    except Exception:
        cap = 64 * _MIB  # safe default: v7x per-TensorCore VMEM
    return int(0.70 * cap)


def _round_down(x, m):
    return (x // m) * m


def _pick_lane_tile(l, n, lane_bytes, lane_budget, max_tl=8192):
    """Largest lane tile (multiple of 128) fitting `lane_budget`, preferring
    tiles that divide L exactly (unmasked, lane-dense output stores)."""
    if l <= 128:
        return l
    cap = min(max_tl, max(128, lane_budget // max(lane_bytes, 1)))
    cap = max(128, _round_down(cap, 128))
    if l <= cap:
        # Whole spatial extent in one block.  If the batch axis alone cannot
        # feed both v7x TensorCores, split into two unmasked halves.
        if n == 1 and l % 256 == 0 and (l // 2) >= 128:
            return l // 2
        return l
    # Largest multiple of 128 <= cap that divides L -> no masked tail block.
    t = cap
    while t >= 128:
        if l % t == 0:
            return t
        t -= 128
    # L is not a multiple of 128: accept one masked tail block rather than
    # padding/copying x (extra HBM traffic would cost more than the mask).
    return cap


def _pick_channel_tile(c, pref=256):
    """Channel tile: full extent if small, else the largest multiple of 128
    that divides c (exact divisor => no partial K block => no garbage in the
    reduction)."""
    if c <= pref:
        return c
    t = max(128, _round_down(pref, 128))
    while t >= 128:
        if c % t == 0:
            return t
        t -= 128
    return c  # awkward channel count: keep full extent


# ----------------------------------------------------------------------------
# Forward
# ----------------------------------------------------------------------------
def conv1x1_forward(
    x_nchw,
    weight,
    bias=None,
    *,
    use_pallas=None,
    force_channel_tiling=False,
    channel_tile_pref=256,
    lane_tile=None,
):
    """1x1 convolution, stride 1 (PyTorch Conv1x1 forward).

    Args:
      x_nchw: (N, C_in, H, W) input, NCHW layout.
      weight: (C_out, C_in) or PyTorch-shaped (C_out, C_in, 1, 1) weight.
      bias:   optional (C_out,) bias (module default is bias=False).
      use_pallas / force_channel_tiling / channel_tile_pref / lane_tile:
              overrides for the automatic path / tile selection (testing).

    Returns:
      (N, C_out, H, W) output, same dtype as x_nchw.
    """
    if weight.ndim == 4:  # (C_out, C_in, 1, 1) -> (C_out, C_in)
        weight = weight.reshape(weight.shape[0], weight.shape[1])

    n, c_in, h, w = x_nchw.shape
    c_out = weight.shape[0]
    l = h * w
    itemsize = jnp.dtype(x_nchw.dtype).itemsize

    # Small-problem fallback: at a few hundred KiB of output the pallas_call
    # fixed cost dominates and XLA fuses the contraction into neighbours.
    if use_pallas is None:
        use_pallas = (n * c_out * l * itemsize) >= 256 * 1024
    if not use_pallas:
        y = jnp.einsum("nchw,oc->nohw", x_nchw, weight)
        if bias is not None:
            y = y + bias[None, :, None, None]
        return y.astype(x_nchw.dtype)

    budget = _vmem_budget_bytes()
    x3d = x_nchw.reshape(n, c_in, l)  # free view: no transpose, no pad
    b2d = (
        jnp.zeros((c_out, 1), x_nchw.dtype)
        if bias is None
        else bias.reshape(c_out, 1).astype(x_nchw.dtype)
    )

    w_bytes = c_out * c_in * itemsize
    cost = pl.CostEstimate(
        flops=2 * n * c_out * c_in * l,
        transcendentals=0,
        bytes_accessed=(n * c_in * l + n * c_out * l) * itemsize
        + w_bytes
        + c_out * itemsize,
    )
    out_shape = jax.ShapeDtypeStruct((n, c_out, l), x_nchw.dtype)

    # Large-channel path when the double-buffered resident weight would eat a
    # large fraction of the (generation-dependent) VMEM budget.
    tiled = force_channel_tiling or (2 * w_bytes > budget // 3)

    if not tiled:
        # ---- simple path: full weight resident, grid over (batch, lane) ----
        lane_bytes = 2 * (c_in + c_out) * itemsize  # dbl-buffered x + o tiles
        lane_budget = max(budget - 2 * w_bytes, budget // 4)
        tl = lane_tile if lane_tile is not None else _pick_lane_tile(
            l, n, lane_bytes, lane_budget
        )
        tl = min(tl, l)
        grid = (n, pl.cdiv(l, tl))

        est = 2 * (c_in + c_out) * tl * itemsize + 2 * w_bytes + 2 * c_out * itemsize
        vmem_limit = int(min(budget, max(4 * est, 32 * _MIB)))

        # NOTE: if tl does not divide L (only when L is not a multiple of 128)
        # the tail x block reads OOB-padded lanes; safe because every output
        # lane depends only on the same input lane across C_in, and the
        # output tail store is masked by Pallas.
        y3d = pl.pallas_call(
            _conv1x1_kernel,
            out_shape=out_shape,
            grid_spec=pltpu.PrefetchScalarGridSpec(
                num_scalar_prefetch=0,
                grid=grid,
                in_specs=[
                    pl.BlockSpec((c_out, c_in), lambda i, j: (0, 0)),
                    pl.BlockSpec((c_out, 1), lambda i, j: (0, 0)),
                    pl.BlockSpec((None, c_in, tl), lambda i, j: (i, 0, j)),
                ],
                out_specs=pl.BlockSpec((None, c_out, tl), lambda i, j: (i, 0, j)),
            ),
            compiler_params=pltpu.CompilerParams(
                # Both axes independent -> megacore sharding on v7x; the tile
                # picker keeps n * grid_l >= 2 when it can do so unmasked.
                dimension_semantics=("parallel", "parallel"),
                vmem_limit_bytes=vmem_limit,
            ),
            cost_estimate=cost,
        )(weight, b2d, x3d)
        return y3d.reshape(n, c_out, h, w)

    # ---- channel-tiled path: grid over (batch, C_out tile, lane tile, K) ----
    tco = _pick_channel_tile(c_out, channel_tile_pref)
    tck = _pick_channel_tile(c_in, channel_tile_pref)
    lane_bytes = 2 * (tck + tco) * itemsize + 4 * tco  # + f32 accumulator
    lane_budget = max(budget - 2 * tco * tck * itemsize, budget // 4)
    tl = lane_tile if lane_tile is not None else _pick_lane_tile(
        l, n, lane_bytes, lane_budget
    )
    tl = min(tl, l)
    grid = (n, pl.cdiv(c_out, tco), pl.cdiv(l, tl), pl.cdiv(c_in, tck))

    est = (
        2 * (tco * tck + tck * tl + tco * tl) * itemsize
        + tco * tl * 4
        + 2 * tco * itemsize
    )
    vmem_limit = int(min(budget, max(4 * est, 32 * _MIB)))

    y3d = pl.pallas_call(
        _conv1x1_tiled_kernel,
        out_shape=out_shape,
        grid_spec=pltpu.PrefetchScalarGridSpec(
            num_scalar_prefetch=0,
            grid=grid,
            in_specs=[
                pl.BlockSpec((tco, tck), lambda i, co, j, kk: (co, kk)),
                pl.BlockSpec((tco, 1), lambda i, co, j, kk: (co, 0)),
                pl.BlockSpec((None, tck, tl), lambda i, co, j, kk: (i, kk, j)),
            ],
            out_specs=pl.BlockSpec((None, tco, tl), lambda i, co, j, kk: (i, co, j)),
            scratch_shapes=[pltpu.VMEM((tco, tl), jnp.float32)],
        ),
        compiler_params=pltpu.CompilerParams(
            dimension_semantics=("parallel", "parallel", "parallel", "arbitrary"),
            vmem_limit_bytes=vmem_limit,
        ),
        cost_estimate=cost,
    )(weight, b2d, x3d)
    return y3d.reshape(n, c_out, h, w)


# ----------------------------------------------------------------------------
# Tests
# ----------------------------------------------------------------------------
if __name__ == "__main__":
    key = jax.random.PRNGKey(0)
    k_x, k_w, k_b, k_x2, k_x3, k_x4, k_w2 = jax.random.split(key, 7)

    HI = jax.lax.Precision.HIGHEST

    # --- module-consistent small shapes (hits the einsum fallback) ---
    N, C_IN, H, W = 2, 4, 16, 16
    C_OUT = 8
    x = jax.random.normal(k_x, (N, C_IN, H, W), dtype=jnp.float32)
    bound = 1.0 / jnp.sqrt(jnp.float32(C_IN))
    weight = jax.random.uniform(k_w, (C_OUT, C_IN), jnp.float32, -bound, bound)
    bias = jax.random.uniform(k_b, (C_OUT,), jnp.float32, -bound, bound)

    ref = jnp.einsum("nchw,oc->nohw", x, weight)
    out = conv1x1_forward(x, weight)  # module default: bias=False
    jax.block_until_ready(out)
    assert out.shape == (N, C_OUT, H, W)
    assert jnp.allclose(out, ref, atol=1e-5, rtol=1e-5)

    out_b = conv1x1_forward(x, weight, bias)
    jax.block_until_ready(out_b)
    assert jnp.allclose(out_b, ref + bias[None, :, None, None], atol=1e-5, rtol=1e-5)

    # --- Pallas simple path (large spatial extent -> adaptive 8K lane tile) ---
    x_big = jax.random.normal(k_x2, (2, C_IN, 128, 128), dtype=jnp.float32)
    out_big = conv1x1_forward(x_big, weight, bias)
    jax.block_until_ready(out_big)
    ref_big = (
        jnp.einsum("nchw,oc->nohw", x_big, weight, precision=HI)
        + bias[None, :, None, None]
    )
    assert jnp.allclose(out_big, ref_big, atol=1e-4, rtol=1e-4)

    # --- Pallas simple path, odd spatial extent (full-extent lane block, no pad) ---
    x_odd = jax.random.normal(k_x3, (2, C_IN, 30, 30), dtype=jnp.float32)
    out_odd = conv1x1_forward(x_odd, weight, use_pallas=True)
    jax.block_until_ready(out_odd)
    ref_odd = jnp.einsum("nchw,oc->nohw", x_odd, weight, precision=HI)
    assert jnp.allclose(out_odd, ref_odd, atol=1e-4, rtol=1e-4)

    # --- Pallas channel-tiled path (C_out / C_in grid + f32 accumulator) ---
    C2_IN, C2_OUT = 256, 256
    x_ch = jax.random.normal(k_x4, (2, C2_IN, 16, 16), dtype=jnp.float32)
    w_ch = jax.random.uniform(
        k_w2, (C2_OUT, C2_IN), jnp.float32, minval=-0.05, maxval=0.05
    )
    out_ch = conv1x1_forward(
        x_ch, w_ch, use_pallas=True, force_channel_tiling=True, channel_tile_pref=128
    )
    jax.block_until_ready(out_ch)
    ref_ch = jnp.einsum("nchw,oc->nohw", x_ch, w_ch, precision=HI)
    assert jnp.allclose(out_ch, ref_ch, atol=1e-2, rtol=1e-2)

    print("KERNEL_OK")
</pallas_src>

<mosaic_0001>
module attributes {stable_mosaic.version = 11 : i64} {
  func.func @_conv1x1_kernel(%arg0: i32, %arg1: i32, %arg2: memref<8x4xf32, #tpu.memory_space<vmem>>, %arg3: memref<8x1xf32, #tpu.memory_space<vmem>>, %arg4: memref<1x4x8192xf32, #tpu.memory_space<vmem>>, %arg5: memref<1x8x8192xf32, #tpu.memory_space<vmem>>) attributes {dimension_semantics = [#tpu.dimension_semantics<parallel>, #tpu.dimension_semantics<parallel>], iteration_bounds = array<i64: 2, 2>, scalar_prefetch = 0 : i64, scratch_operands = 0 : i64, tpu.core_type = #tpu.core_type<tc>, window_params = [{pipeline_mode = #tpu.pipeline_mode<synchronous>, transform_indices = @transform_0, window_bounds = array<i64: 8, 4>}, {pipeline_mode = #tpu.pipeline_mode<synchronous>, transform_indices = @transform_1, window_bounds = array<i64: 8, 1>}, {transform_indices = @transform_2, window_bounds = array<i64: 1, 4, 8192>}, {transform_indices = @transform_3, window_bounds = array<i64: 1, 8, 8192>}]} {
    %c0 = arith.constant 0 : index
    %c0_0 = arith.constant 0 : index
    %0 = vector.load %arg2[%c0, %c0_0] : memref<8x4xf32, #tpu.memory_space<vmem>>, vector<8x4xf32>
    %c0_1 = arith.constant 0 : index
    %c0_2 = arith.constant 0 : index
    %c0_3 = arith.constant 0 : index
    %1 = vector.load %arg4[%c0_1, %c0_2, %c0_3] : memref<1x4x8192xf32, #tpu.memory_space<vmem>>, vector<1x4x8192xf32>
    %2 = vector.shape_cast %1 : vector<1x4x8192xf32> to vector<4x8192xf32>
    %cst = arith.constant dense<0.000000e+00> : vector<8x8192xf32>
    %3 = tpu.matmul %0, %2, %cst {dimension_numbers = #tpu.dot_dimension_numbers<[1], [0], [0], [1], [0, 0, 1, 1], [], []>} : vector<8x4xf32>, vector<4x8192xf32>, vector<8x8192xf32> -> vector<8x8192xf32>
    %c0_4 = arith.constant 0 : index
    %c0_5 = arith.constant 0 : index
    %4 = vector.load %arg3[%c0_4, %c0_5] : memref<8x1xf32, #tpu.memory_space<vmem>>, vector<8x1xf32>
    %5 = vector.broadcast %4 : vector<8x1xf32> to vector<8x8192xf32>
    %6 = arith.addf %3, %5 : vector<8x8192xf32>
    %c0_6 = arith.constant 0 : index
    %c0_7 = arith.constant 0 : index
    %c0_8 = arith.constant 0 : index
    %7 = vector.load %arg5[%c0_6, %c0_7, %c0_8] : memref<1x8x8192xf32, #tpu.memory_space<vmem>>, vector<1x8x8192xf32>
    %8 = vector.shape_cast %7 : vector<1x8x8192xf32> to vector<8x8192xf32>
    %9 = vector.shape_cast %6 : vector<8x8192xf32> to vector<1x8x8192xf32>
    tpu.vector_store %arg5[%c0_6, %c0_7, %c0_8], %9 {strides = array<i32>} : memref<1x8x8192xf32, #tpu.memory_space<vmem>>, vector<1x8x8192xf32>,
    return
  }
  func.func @transform_0(%arg0: i32, %arg1: i32) -> (i32, i32) {
    %c0_i32 = arith.constant 0 : i32
    %c0_i32_0 = arith.constant 0 : i32
    %c0_i32_1 = arith.constant 0 : i32
    return %c0_i32, %c0_i32_0 : i32, i32
  }
  func.func @transform_1(%arg0: i32, %arg1: i32) -> (i32, i32) {
    %c0_i32 = arith.constant 0 : i32
    %c0_i32_0 = arith.constant 0 : i32
    %c0_i32_1 = arith.constant 0 : i32
    return %c0_i32, %c0_i32_0 : i32, i32
  }
  func.func @transform_2(%arg0: i32, %arg1: i32) -> (i32, i32, i32) {
    %c0_i32 = arith.constant 0 : i32
    %c0_i32_0 = arith.constant 0 : i32
    return %arg0, %c0_i32, %arg1 : i32, i32, i32
  }
  func.func @transform_3(%arg0: i32, %arg1: i32) -> (i32, i32, i32) {
    %c0_i32 = arith.constant 0 : i32
    %c0_i32_0 = arith.constant 0 : i32
    return %arg0, %c0_i32, %arg1 : i32, i32, i32
  }
}

</mosaic_0001>

<bundles_post_ra>
// kernel: tpu_custom_call.1
= control target key start
LH: loop header
LB: loop body
LE: loop exit
PB: predicated region body
PF: predicated region fallthrough
CT: control target
= control target key end

     0   :  { %8 = vsyncpa [#allocation3], 0  ;;  %s3793_s0 = inlined_call_operand.vmem [shape: f32[8,4], index: 0, kind: input, shape index: {}]   ;;  %s3794_s1 = inlined_call_operand.vmem [shape: f32[8,1], index: 1, kind: input, shape index: {}]   ;;  %s3795_s2 = inlined_call_operand.hbm [shape: f32[2,4,16384], index: 2, kind: input, shape index: {}]   ;;  %s3796_s3 = inlined_call_operand.hbm [shape: f32[2,8,16384], index: 3, kind: output, shape index: {}]  }
   0x1   :  { %10 = vsyncpa [#allocation3 + $0x1], 0 }
   0x2   :  { %11 = vsyncpa [#allocation4], 0 }
   0x3   :  { %13 = vsyncpa [#allocation4 + $0x1], 0  ;;  %s3263_s12 = smov 0   ;;  %s3265_s13 = smov 0  }
   0x4   :  { %s3267_s14 = smov 0   ;;  %s3269_s15 = smov 0  }
   0x5   :  { %s3271_s16 = smov 0   ;;  %s3273_s17 = smov 0  }
   0x6   :  { %s3275_s18 = smov 0   ;;  %s3277_s19 = smov 0  }
   0x7 LB: > { %s2883_s20 = sadd.s32 4294967295, %s3237_s19   ;;  %s2884_s21 = sadd.s32 4294967294, %s3237_s19   ;;  %s3237_s19 = sphi %s3277_s19, %s19_s19   ;;  %s3233_s18 = sphi %s3275_s18, %s3813_s18   ;;  %s3229_s17 = sphi %s3273_s17, %s3812_s17   ;;  %s3225_s16 = sphi %s3271_s16, %s3811_s16   ;;  %s3221_s15 = sphi %s3269_s15, %s3810_s15   ;;  %s3217_s14 = sphi %s3267_s14, %s3809_s14   ;;  %s3213_s13 = sphi %s3265_s13, %s3808_s13   ;;  %s3209_s12 = sphi %s3263_s12, %s3807_s12  }
   0x8   : > { %s28_s22 = sadd.s32 1, %s3229_s17  ;;  %s31_s23 = sadd.s32 1, %s3233_s18 }
   0x9   : > { %p29_p0 = scmp.ge.s32.totalorder %s28_s22, 2  ;;  %s82_s24 = sadd.s32 1, %s3217_s14 }
   0xa   : > { %p89_p1 = scmp.ne.s32.totalorder %s3217_s14, %s3213_s13  ;;  %p90_p2 = scmp.eq.s32.totalorder %s3237_s19, 0 }
   0xb   : > { %s3815_s22 = smov (%p29_p0, %s28_s22), 0  ;;  %s3817_s23 = smov (!%p29_p0, %s31_s23), %s3233_s18 }
   0xc   : > { %s78_s25 = ssub.s32 %s3229_s17, %s3815_s22  ;;  %p3316_p3 = por %p90_p2, %p89_p1 }
   0xd   : > { %p33_p4 = scmp.ge.s32.totalorder %s3817_s23, 2  ;;  %p95_p5 = scmp.ne.s32.totalorder %s3213_s13, %s3209_s12 }
   0xe   : > { %p96_p6 = scmp.eq.s32.totalorder %s2883_s20, 0  ;;  %p121_p7 = scmp.eq.s32.totalorder %s2883_s20, 3 }
   0xf   : > { %s3819_s23 = smov (%p33_p4, %s3817_s23), 0  ;;  %p127_p10 = scmp.eq.s32.totalorder %s2884_s21, 3 }
  0x10   : > { %p3324_p8 = por %p96_p6, %p95_p5  ;;  %p3328_p9 = por %p121_p7, %p89_p1 }
  0x11   : > { %s77_s29 = ssub.s32 %s3233_s18, %s3819_s23  ;;  %p3334_p12 = por %p127_p10, %p95_p5 }
  0x12   : > { %s3800_s28 = scalar_select %p3328_p9, 1, 0 }
  0x13   : > { %s79_s30 = sor.u32 %s78_s25, %s77_s29  ;;  %p3008_p13 = scmp.lt.s32.totalorder %s3237_s19, 4 }
  0x14   : > { %p80_p11 = scmp.eq.s32.totalorder %s79_s30, 0  ;;  %s153_s5 = sand.u32 1, %s3217_s14  }
  0x15   : > { %s3801_s4 = scalar_select %p3334_p12, 1, 0 }
  0x16   : > { %s3341_s6 = scalar_select %p80_p11, %s3217_s14, %s82_s24  }
  0x17   : > { %s2887_s7 = sshll.u32 %s153_s5, 8  ;;  %s2888_s8 = sshll.u32 %s3229_s17, 6 }
  0x18   : > { %s2889_s9 = sshll.u32 %s3233_s18, 7  ;;  %s157_s10 = scalar_lea.vmem [#allocation2], %s2887_s7 }
  0x19   : > { %s167_s11 = sshll.u32 %s157_s10, 4  ;;  %s163_s20 = sadd.s32 %s2889_s9, %s2888_s8  ;;  %s3345_s11 = int_to_ptr.vmem [resolvable:$true] %s167_s11 }
  0x1a   : > { %s2890_s21 = sshll.u32 %s163_s20, 6  ;;  %p3349_p0 = pnand %p3008_p13, %p3316_p3 }
  0x1b   : > { %s3356_s24 = scalar_lea.hbm %s3795_s2, %s2890_s21  ;;  %s154_s7 = scalar_lea.sflag [#allocation3], %s153_s5 }
  0x1c   : > { %s3109_s8 = scalar_lea.hbm %s3356_s24, 4096  ;;  %p3111_p3 = pneg %p3349_p0 }
  0x1d   : > { %p3110_p4 = scmp.ne.s32.totalorder %s3356_s24, %s3109_s8  ;;  %s3114_s10 = scalar_lea.hbm %s3795_s2, 16384 }
  0x1e   : > { %p3115_p7 = scmp.lt.u32.totalorder %s3356_s24, %s3795_s2  ;;  %p3116_p10 = scmp.lt.u32.totalorder %s3114_s10, %s3109_s8 }
  0x1f   : > { %p3112_p5 = pnand %p3111_p3, %p3110_p4  ;;  %p3118_p13 = scmp.lt.u32.totalorder %s3109_s8, %s3356_s24 }
  0x20   : > { %p3117_p11 = por %p3116_p10, %p3115_p7 }
  0x21   : > { %p3113_p6 = pneg %p3112_p5 }
  0x22   : > { %p3119_p1 = por %p3118_p13, %p3117_p11 }
  0x24   : > { %p3120_p2 = pnand %p3119_p1, %p3113_p6 }
  0x26   : > { %3123 = shalt.err (!%p3120_p2)
}
  0x27   : > { %s3124_s5 = scalar_lea.vmem %s3345_s11, 4096  ;;  %s3239_s29 = smov [#allocation2]  }
  0x28   : > { %p3125_p4 = scmp.ne.s32.totalorder %s3345_s11, %s3124_s5  ;;  %s3129_s30 = sshll.u32 %s3239_s29, 4  ;;  %s3130_s30 = int_to_ptr.vmem [resolvable:$false] %s3129_s30 }
  0x29   : > { %s3131_s26 = scalar_lea.vmem %s3130_s30, 8192  ;;  %p3132_p9 = scmp.lt.s32.totalorder %s3345_s11, %s3130_s30 }
  0x2a   : > { %p3127_p5 = pnand %p3125_p4, %p3111_p3  ;;  %p3133_p7 = scmp.lt.s32.totalorder %s3131_s26, %s3124_s5 }
  0x2c   : > { %p3128_p12 = pneg %p3127_p5  ;;  %p3134_p10 = por %p3133_p7, %p3132_p9 }
  0x2e   : > { %p3135_p11 = pnand %p3134_p10, %p3128_p12 }
  0x30   : > { %3138 = shalt.err (!%p3135_p11)
}
  0x31   : > { %3003 = dma.hbm_to_vmem [thread:$0]  (!%p3349_p0), %s3356_s24, 4096, %s3345_s11, %s154_s7  }
  0x32   : > { %p3803_p1 = scmp.lt.s32.totalorder %s3237_s19, 5  ;;  %p3804_p2 = scmp.ge.s32.totalorder %s3237_s19, 1 }
  0x34   : > { %p173_p3 = pnand %p3804_p2, %p3803_p1 }
  0x35   : > { %s3390_s8 = sand.u32 (!%p173_p3), 1, %s3213_s13  }
  0x36   : > { %176 = sbr.rel (%p173_p3) target bundleno = 356 (0x164), region = 32  ;;  %s2892_s9 = sshll.u32 (!%p173_p3), %s3390_s8, 8 }
  0x37   : > { %s179_s10 = scalar_lea.sflag (!%p173_p3), [#allocation3], %s3390_s8  ;;  %s3394_s20 = scalar_lea.vmem (!%p173_p3), [#allocation2], %s2892_s9 }
  0x3d   : > { %3200 = dma.done.wait (%p3324_p8), %s179_s10, 4096  }
  0x3e   : > { %3202 = vsyncadd (%p3324_p8), %s179_s10, 4294963200  ;;  %v3240_v0 = vmov 0.0   ;;  %v3241_v1 = vmov 0   ;;  %v208_v2 = vld [vmem:[%s3394_s20] sm:$0xff]  ;;  %vm314_vm0 = vcmask 1043456   ;;  %v209_v3 = vld [vmem:[%s3394_s20 + $0x8] sm:$0xff] }
  0x3f   : > { %507 = vmatprep.mubr.f32.mxu0 %v3240_v0  ;;  %578 = vmatprep.mubr.f32.mxu1 %v3240_v0  ;;  %v278_v4 = vcombine.high %v208_v2, %v208_v2  ;;  %v279_v5 = vcombine.high %v209_v3, %v209_v3  ;;  %v210_v6 = vld [vmem:[%s3394_s20 + $0x10] sm:$0xff]  ;;  %v211_v7 = vld [vmem:[%s3394_s20 + $0x18] sm:$0xff]  ;;  %v3409_v8 = vld [vmem:[%s3793_s0] sm:$0xff]  ;;  %vm310_vm1 = vcmask 31744   ;;  %s2893_s7 = sshll.u32 %s3390_s8, 9  ;;  %s2991_s5 = sshll.u32 %s3221_s15, 6 }
  0x40   : > { %3076 = vset.pattern.permute.xlu0 %v3241_v1  ;;  %v280_v9 = vcombine.high %v210_v6, %v210_v6  ;;  %v281_v10 = vcombine.high %v211_v7, %v211_v7  ;;  %v212_v11 = vld [vmem:[%s3394_s20 + $0x20] sm:$0xff]  ;;  %v213_v12 = vld [vmem:[%s3394_s20 + $0x28] sm:$0xff]  ;;  %v214_v15 = vld [vmem:[%s3394_s20 + $0x30] sm:$0xff]  ;;  %s3607_s21 = scalar_lea.vmem [#allocation5], %s2893_s7  ;;  %s2992_s29 = sshll.u32 %s3225_s16, 7 }
  0x41   : > { %2894 = vmatprep.subr.msk.mxu0 %vm314_vm0, %v278_v4  ;;  %2897 = vmatprep.subr.msk.mxu1 %vm314_vm0, %v279_v5  ;;  %v282_v13 = vcombine.high %v212_v11, %v212_v11  ;;  %v283_v14 = vcombine.high %v213_v12, %v213_v12  ;;  %v215_v16 = vld [vmem:[%s3394_s20 + $0x38] sm:$0xff]  ;;  %v284_v17 = vcombine.high %v214_v15, %v214_v15  ;;  %v216_v19 = vld [vmem:[%s3394_s20 + $0x40] sm:$0xff]  ;;  %v217_v20 = vld [vmem:[%s3394_s20 + $0x48] sm:$0xff]  ;;  %s2792_s30 = sadd.s32 %s2992_s29, %s2991_s5  ;;  %s2796_s16 = sshll.u32 %s3607_s21, 4  ;;  %s3737_s16 = int_to_ptr.vmem [resolvable:$true] %s2796_s16 }
  0x42   : > { %2895 = vmatpush1.msk.msra.mxu0 %vm314_vm0, %v208_v2  ;;  %2898 = vmatpush1.msk.msra.mxu1 %vm314_vm0, %v209_v3  ;;  %v285_v18 = vcombine.high %v215_v16, %v215_v16  ;;  %v286_v21 = vcombine.high %v216_v19, %v216_v19  ;;  %v287_v22 = vcombine.high %v217_v20, %v217_v20  ;;  %v218_v23 = vld [vmem:[%s3394_s20 + $0x50] sm:$0xff]  ;;  %v219_v24 = vld [vmem:[%s3394_s20 + $0x58] sm:$0xff]  ;;  %v220_v27 = vld [vmem:[%s3394_s20 + $0x60] sm:$0xff]  ;;  %s2993_s15 = sshll.u32 %s2792_s30, 7  ;;  %s3139_s27 = scalar_lea.vmem %s3737_s16, 8192 }
  0x43   : > { %2896 = vmatmul.mubr.msk.f32.vlgmr.msra.gmra.mrb[0].mxu0 %vm310_vm1, %v3409_v8  ;;  %2899 = vmatmul.mubr.msk.f32.vlgmr.msra.gmra.mrb[0].mxu1 %vm310_vm1, %v3409_v8  ;;  %v288_v25 = vcombine.high %v218_v23, %v218_v23  ;;  %v289_v26 = vcombine.high %v219_v24, %v219_v24  ;;  %v221_v28 = vld [vmem:[%s3394_s20 + $0x68] sm:$0xff]  ;;  %v290_v29 = vcombine.high %v220_v27, %v220_v27  ;;  %v222_v31 = vld [vmem:[%s3394_s20 + $0x70] sm:$0xff]  ;;  %v223_v32 = vld [vmem:[%s3394_s20 + $0x78] sm:$0xff]  ;;  %s3735_s10 = scalar_lea.hbm %s3796_s3, %s2993_s15  ;;  %p3140_p8 = scmp.ne.s32.totalorder %s3737_s16, %s3139_s27 }
  0x44   : > { %2900 = vmatprep.subr.msk.mxu0 %vm314_vm0, %v280_v9  ;;  %2903 = vmatprep.subr.msk.mxu1 %vm314_vm0, %v281_v10  ;;  %v291_v30 = vcombine.high %v221_v28, %v221_v28  ;;  %v292_v33 = vcombine.high %v222_v31, %v222_v31  ;;  %v293_v34 = vcombine.high %v223_v32, %v223_v32  ;;  %v224_v35 = vld [vmem:[%s3394_s20 + $0x80] sm:$0xff]  ;;  %v225_v36 = vld [vmem:[%s3394_s20 + $0x88] sm:$0xff]  ;;  %v226_v39 = vld [vmem:[%s3394_s20 + $0x90] sm:$0xff]  ;;  %p3805_p9 = scmp.ne.s32.totalorder %s3800_s28, 0  ;;  %s3242_s11 = smov [#allocation5]  }
  0x45   : > { %2901 = vmatpush1.msk.msra.mxu0 %vm314_vm0, %v210_v6  ;;  %2904 = vmatpush1.msk.msra.mxu1 %vm314_vm0, %v211_v7  ;;  %v294_v37 = vcombine.high %v224_v35, %v224_v35  ;;  %v295_v38 = vcombine.high %v225_v36, %v225_v36  ;;  %v227_v40 = vld [vmem:[%s3394_s20 + $0x98] sm:$0xff]  ;;  %v296_v41 = vcombine.high %v226_v39, %v226_v39  ;;  %v228_v43 = vld [vmem:[%s3394_s20 + $0xa0] sm:$0xff]  ;;  %v229_v44 = vld [vmem:[%s3394_s20 + $0xa8] sm:$0xff]  ;;  %s3143_s25 = sshll.u32 %s3242_s11, 4  ;;  %s3144_s25 = int_to_ptr.vmem [resolvable:$false] %s3143_s25 }
  0x46   : > { %649 = vmatprep.mubr.f32.mxu0 %v3240_v0  ;;  %720 = vmatprep.mubr.f32.mxu1 %v3240_v0  ;;  %v297_v42 = vcombine.high %v227_v40, %v227_v40  ;;  %v298_v45 = vcombine.high %v228_v43, %v228_v43  ;;  %v299_v46 = vcombine.high %v229_v44, %v229_v44  ;;  %v230_v47 = vld [vmem:[%s3394_s20 + $0xb0] sm:$0xff]  ;;  %v231_v48 = vld [vmem:[%s3394_s20 + $0xb8] sm:$0xff]  ;;  %v232_v51 = vld [vmem:[%s3394_s20 + $0xc0] sm:$0xff]  ;;  %p3141_p12 = pnand %p3140_p8, %p3805_p9  ;;  %s3145_s24 = scalar_lea.vmem %s3144_s25, 16384 }
  0x47   : > { %2902 = vmatmul.mubr.msk.f32.vlgmr.msra.gmra.mrb[2].mxu0 %vm310_vm1, %v3409_v8  ;;  %2905 = vmatmul.mubr.msk.f32.vlgmr.msra.gmra.mrb[2].mxu1 %vm310_vm1, %v3409_v8  ;;  %v300_v49 = vcombine.high %v230_v47, %v230_v47  ;;  %v301_v50 = vcombine.high %v231_v48, %v231_v48  ;;  %v233_v52 = vld [vmem:[%s3394_s20 + $0xc8] sm:$0xff]  ;;  %v302_v53 = vcombine.high %v232_v51, %v232_v51  ;;  %v234_v55 = vld [vmem:[%s3394_s20 + $0xd0] sm:$0xff]  ;;  %v235_v56 = vld [vmem:[%s3394_s20 + $0xd8] sm:$0xff]  ;;  %p3146_p6 = scmp.lt.s32.totalorder %s3737_s16, %s3144_s25  ;;  %p3147_p13 = scmp.lt.s32.totalorder %s3145_s24, %s3139_s27 }
  0x48   : > { %2906 = vmatprep.subr.msk.mxu0 %vm314_vm0, %v282_v13  ;;  %2909 = vmatprep.subr.msk.mxu1 %vm314_vm0, %v283_v14  ;;  %v303_v54 = vcombine.high %v233_v52, %v233_v52  ;;  %v304_v57 = vcombine.high %v234_v55, %v234_v55  ;;  %v305_v58 = vcombine.high %v235_v56, %v235_v56  ;;  %v236_v59 = vld [vmem:[%s3394_s20 + $0xe0] sm:$0xff]  ;;  %v237_v60 = vld [vmem:[%s3394_s20 + $0xe8] sm:$0xff]  ;;  %v238_v63 = vld [vmem:[%s3394_s20 + $0xf0] sm:$0xff]  ;;  %p3142_p0 = pneg %p3141_p12 }
  0x49   : > { %2907 = vmatpush1.msk.msra.mxu0 %vm314_vm0, %v212_v11  ;;  %2910 = vmatpush1.msk.msra.mxu1 %vm314_vm0, %v213_v12  ;;  %v306_v61 = vcombine.high %v236_v59, %v236_v59  ;;  %v307_v62 = vcombine.high %v237_v60, %v237_v60  ;;  %v239_v1 = vld [vmem:[%s3394_s20 + $0xf8] sm:$0xff]  ;;  %v308_v2 = vcombine.high %v238_v63, %v238_v63  ;;  %v240_v4 = vld [vmem:[%s3794_s1] sm:$0xff]  ;;  %s2780_s20 = scalar_lea.sflag [#allocation4], %s3390_s8  ;;  %p3148_p4 = por %p3147_p13, %p3146_p6 }
  0x4a   : > { %791 = vmatprep.mubr.f32.mxu0 %v3240_v0  ;;  %862 = vmatprep.mubr.f32.mxu1 %v3240_v0  ;;  %v309_v3 = vcombine.high %v239_v1, %v239_v1 }
  0x4b   : > { %2908 = vmatmul.mubr.msk.f32.vlgmr.msra.gmra.mrb[4].mxu0 %vm310_vm1, %v3409_v8  ;;  %2911 = vmatmul.mubr.msk.f32.vlgmr.msra.gmra.mrb[4].mxu1 %vm310_vm1, %v3409_v8  ;;  %p3149_p5 = pnand %p3148_p4, %p3142_p0 }
  0x4c   : > { %2912 = vmatprep.subr.msk.mxu0 %vm314_vm0, %v284_v17  ;;  %2915 = vmatprep.subr.msk.mxu1 %vm314_vm0, %v285_v18 }
  0x4d   : > { %2913 = vmatpush1.msk.msra.mxu0 %vm314_vm0, %v214_v15  ;;  %2916 = vmatpush1.msk.msra.mxu1 %vm314_vm0, %v215_v16 }
  0x4e   : > { %933 = vmatprep.mubr.f32.mxu0 %v3240_v0  ;;  %1004 = vmatprep.mubr.f32.mxu1 %v3240_v0 }
  0x4f   : > { %2914 = vmatmul.mubr.msk.f32.vlgmr.msra.gmra.mrb[6].mxu0 %vm310_vm1, %v3409_v8  ;;  %2917 = vmatmul.mubr.msk.f32.vlgmr.msra.gmra.mrb[6].mxu1 %vm310_vm1, %v3409_v8 }
  0x50   : > { %2918 = vmatprep.subr.msk.mxu0 %vm314_vm0, %v286_v21  ;;  %2921 = vmatprep.subr.msk.mxu1 %vm314_vm0, %v287_v22 }
  0x51   : > { %2919 = vmatpush1.msk.msra.mxu0 %vm314_vm0, %v216_v19  ;;  %2922 = vmatpush1.msk.msra.mxu1 %vm314_vm0, %v217_v20 }
  0x52   : > { %1075 = vmatprep.mubr.f32.mxu0 %v3240_v0  ;;  %1146 = vmatprep.mubr.f32.mxu1 %v3240_v0 }
  0x53   : > { %2920 = vmatmul.mubr.msk.f32.vlgmr.msra.gmra.mrb[8].mxu0 %vm310_vm1, %v3409_v8  ;;  %2923 = vmatmul.mubr.msk.f32.vlgmr.msra.gmra.mrb[8].mxu1 %vm310_vm1, %v3409_v8 }
  0x54   : > { %2924 = vmatprep.subr.msk.mxu0 %vm314_vm0, %v288_v25  ;;  %2927 = vmatprep.subr.msk.mxu1 %vm314_vm0, %v289_v26 }
  0x55   : > { %2925 = vmatpush1.msk.msra.mxu0 %vm314_vm0, %v218_v23  ;;  %2928 = vmatpush1.msk.msra.mxu1 %vm314_vm0, %v219_v24 }
  0x56   : > { %1217 = vmatprep.mubr.f32.mxu0 %v3240_v0  ;;  %1288 = vmatprep.mubr.f32.mxu1 %v3240_v0 }
  0x57   : > { %2926 = vmatmul.mubr.msk.f32.vlgmr.msra.gmra.mrb[10].mxu0 %vm310_vm1, %v3409_v8  ;;  %2929 = vmatmul.mubr.msk.f32.vlgmr.msra.gmra.mrb[10].mxu1 %vm310_vm1, %v3409_v8 }
  0x58   : > { %2930 = vmatprep.subr.msk.mxu0 %vm314_vm0, %v290_v29  ;;  %2933 = vmatprep.subr.msk.mxu1 %vm314_vm0, %v291_v30 }
  0x59   : > { %2931 = vmatpush1.msk.msra.mxu0 %vm314_vm0, %v220_v27  ;;  %2934 = vmatpush1.msk.msra.mxu1 %vm314_vm0, %v221_v28 }
  0x5a   : > { %1359 = vmatprep.mubr.f32.mxu0 %v3240_v0  ;;  %1430 = vmatprep.mubr.f32.mxu1 %v3240_v0 }
  0x5b   : > { %2932 = vmatmul.mubr.msk.f32.vlgmr.msra.gmra.mrb[12].mxu0 %vm310_vm1, %v3409_v8  ;;  %2935 = vmatmul.mubr.msk.f32.vlgmr.msra.gmra.mrb[12].mxu1 %vm310_vm1, %v3409_v8 }
  0x5c   : > { %2936 = vmatprep.subr.msk.mxu0 %vm314_vm0, %v292_v33  ;;  %2939 = vmatprep.subr.msk.mxu1 %vm314_vm0, %v293_v34 }
  0x5d   : > { %2937 = vmatpush1.msk.msra.mxu0 %vm314_vm0, %v222_v31  ;;  %2940 = vmatpush1.msk.msra.mxu1 %vm314_vm0, %v223_v32 }
  0x5e   : > { %1501 = vmatprep.mubr.f32.mxu0 %v3240_v0  ;;  %1572 = vmatprep.mubr.f32.mxu1 %v3240_v0 }
  0x5f   : > { %2938 = vmatmul.mubr.msk.f32.vlgmr.msra.gmra.mrb[14].mxu0 %vm310_vm1, %v3409_v8  ;;  %2941 = vmatmul.mubr.msk.f32.vlgmr.msra.gmra.mrb[14].mxu1 %vm310_vm1, %v3409_v8 }
  0x60   : > { %2942 = vmatprep.subr.msk.mxu0 %vm314_vm0, %v294_v37  ;;  %2945 = vmatprep.subr.msk.mxu1 %vm314_vm0, %v295_v38 }
  0x61   : > { %2943 = vmatpush1.msk.msra.mxu0 %vm314_vm0, %v224_v35  ;;  %2946 = vmatpush1.msk.msra.mxu1 %vm314_vm0, %v225_v36 }
  0x62   : > { %1643 = vmatprep.mubr.f32.mxu0 %v3240_v0  ;;  %1714 = vmatprep.mubr.f32.mxu1 %v3240_v0 }
  0x63   : > { %2944 = vmatmul.mubr.msk.f32.vlgmr.msra.gmra.mrb[16].mxu0 %vm310_vm1, %v3409_v8  ;;  %2947 = vmatmul.mubr.msk.f32.vlgmr.msra.gmra.mrb[16].mxu1 %vm310_vm1, %v3409_v8 }
  0x64   : > { %2948 = vmatprep.subr.msk.mxu0 %vm314_vm0, %v296_v41  ;;  %2951 = vmatprep.subr.msk.mxu1 %vm314_vm0, %v297_v42 }
  0x65   : > { %2949 = vmatpush1.msk.msra.mxu0 %vm314_vm0, %v226_v39  ;;  %2952 = vmatpush1.msk.msra.mxu1 %vm314_vm0, %v227_v40 }
  0x66   : > { %1785 = vmatprep.mubr.f32.mxu0 %v3240_v0  ;;  %1856 = vmatprep.mubr.f32.mxu1 %v3240_v0 }
  0x67   : > { %2950 = vmatmul.mubr.msk.f32.vlgmr.msra.gmra.mrb[18].mxu0 %vm310_vm1, %v3409_v8  ;;  %2953 = vmatmul.mubr.msk.f32.vlgmr.msra.gmra.mrb[18].mxu1 %vm310_vm1, %v3409_v8 }
  0x68   : > { %2954 = vmatprep.subr.msk.mxu0 %vm314_vm0, %v298_v45  ;;  %2957 = vmatprep.subr.msk.mxu1 %vm314_vm0, %v299_v46 }
  0x69   : > { %2955 = vmatpush1.msk.msra.mxu0 %vm314_vm0, %v228_v43  ;;  %2958 = vmatpush1.msk.msra.mxu1 %vm314_vm0, %v229_v44 }
  0x6a   : > { %1927 = vmatprep.mubr.f32.mxu0 %v3240_v0  ;;  %1998 = vmatprep.mubr.f32.mxu1 %v3240_v0 }
  0x6b   : > { %2956 = vmatmul.mubr.msk.f32.vlgmr.msra.gmra.mrb[20].mxu0 %vm310_vm1, %v3409_v8  ;;  %2959 = vmatmul.mubr.msk.f32.vlgmr.msra.gmra.mrb[20].mxu1 %vm310_vm1, %v3409_v8 }
  0x6c   : > { %2960 = vmatprep.subr.msk.mxu0 %vm314_vm0, %v300_v49  ;;  %2963 = vmatprep.subr.msk.mxu1 %vm314_vm0, %v301_v50 }
  0x6d   : > { %2961 = vmatpush1.msk.msra.mxu0 %vm314_vm0, %v230_v47  ;;  %2964 = vmatpush1.msk.msra.mxu1 %vm314_vm0, %v231_v48 }
  0x6e   : > { %2069 = vmatprep.mubr.f32.mxu0 %v3240_v0  ;;  %2140 = vmatprep.mubr.f32.mxu1 %v3240_v0 }
  0x6f   : > { %2962 = vmatmul.mubr.msk.f32.vlgmr.msra.gmra.mrb[22].mxu0 %vm310_vm1, %v3409_v8  ;;  %2965 = vmatmul.mubr.msk.f32.vlgmr.msra.gmra.mrb[22].mxu1 %vm310_vm1, %v3409_v8 }
  0x70   : > { %2966 = vmatprep.subr.msk.mxu0 %vm314_vm0, %v302_v53  ;;  %2969 = vmatprep.subr.msk.mxu1 %vm314_vm0, %v303_v54 }
  0x71   : > { %2967 = vmatpush1.msk.msra.mxu0 %vm314_vm0, %v232_v51  ;;  %2970 = vmatpush1.msk.msra.mxu1 %vm314_vm0, %v233_v52 }
  0x72   : > { %2211 = vmatprep.mubr.f32.mxu0 %v3240_v0  ;;  %2282 = vmatprep.mubr.f32.mxu1 %v3240_v0 }
  0x73   : > { %2968 = vmatmul.mubr.msk.f32.vlgmr.msra.gmra.mrb[24].mxu0 %vm310_vm1, %v3409_v8  ;;  %2971 = vmatmul.mubr.msk.f32.vlgmr.msra.gmra.mrb[24].mxu1 %vm310_vm1, %v3409_v8 }
  0x74   : > { %2972 = vmatprep.subr.msk.mxu0 %vm314_vm0, %v304_v57  ;;  %2975 = vmatprep.subr.msk.mxu1 %vm314_vm0, %v305_v58 }
  0x75   : > { %2973 = vmatpush1.msk.msra.mxu0 %vm314_vm0, %v234_v55  ;;  %2976 = vmatpush1.msk.msra.mxu1 %vm314_vm0, %v235_v56 }
  0x76   : > { %2353 = vmatprep.mubr.f32.mxu0 %v3240_v0  ;;  %2424 = vmatprep.mubr.f32.mxu1 %v3240_v0 }
  0x77   : > { %2974 = vmatmul.mubr.msk.f32.vlgmr.msra.gmra.mrb[26].mxu0 %vm310_vm1, %v3409_v8  ;;  %2977 = vmatmul.mubr.msk.f32.vlgmr.msra.gmra.mrb[26].mxu1 %vm310_vm1, %v3409_v8 }
  0x78   : > { %2978 = vmatprep.subr.msk.mxu0 %vm314_vm0, %v306_v61  ;;  %2981 = vmatprep.subr.msk.mxu1 %vm314_vm0, %v307_v62 }
  0x79   : > { %2979 = vmatpush1.msk.msra.mxu0 %vm314_vm0, %v236_v59  ;;  %2982 = vmatpush1.msk.msra.mxu1 %vm314_vm0, %v237_v60 }
  0x7a   : > { %2495 = vmatprep.mubr.f32.mxu0 %v3240_v0  ;;  %2566 = vmatprep.mubr.f32.mxu1 %v3240_v0 }
  0x7b   : > { %2980 = vmatmul.mubr.msk.f32.vlgmr.msra.gmra.mrb[28].mxu0 %vm310_vm1, %v3409_v8  ;;  %2983 = vmatmul.mubr.msk.f32.vlgmr.msra.gmra.mrb[28].mxu1 %vm310_vm1, %v3409_v8 }
  0x7c   : > { %2984 = vmatprep.subr.msk.mxu0 %vm314_vm0, %v308_v2  ;;  %2987 = vmatprep.subr.msk.mxu1 %vm314_vm0, %v309_v3 }
  0x7d   : > { %2985 = vmatpush1.msk.msra.mxu0 %vm314_vm0, %v238_v63  ;;  %2988 = vmatpush1.msk.msra.mxu1 %vm314_vm0, %v239_v1 }
  0x7e   : > { %2637 = vmatprep.mubr.f32.mxu0 %v3240_v0  ;;  %2708 = vmatprep.mubr.f32.mxu1 %v3240_v0 }
  0x7f   : > { %2986 = vmatmul.mubr.msk.f32.vlgmr.msra.gmra.mrb[30].mxu0 %vm310_vm1, %v3409_v8  ;;  %2989 = vmatmul.mubr.msk.f32.vlgmr.msra.gmra.mrb[30].mxu1 %vm310_vm1, %v3409_v8 }
  0x80   : > { %243 = vperm.xlu0 %3076, %v240_v4  }
  0xff   : > { %v3601_v5 = vpop.permute.xlu0 %243 }
 0x116   : > { %v509_v6 = vpop.f32.mrb[0].mxu0  ;;  %v580_v7 = vpop.f32.mrb[0].mxu1 }
 0x117   : > { %v510_v9 = vadd.f32 %v509_v6, %v3601_v5  ;;  %v581_v10 = vadd.f32 %v580_v7, %v3601_v5  ;;  %v511_v11 = vpop.f32.mrb[1].mxu0  ;;  %v582_v12 = vpop.f32.mrb[1].mxu1 }
 0x118   : > { %v512_v0 = vadd.f32 %v511_v11, %v3601_v5  ;;  %v583_v13 = vadd.f32 %v582_v12, %v3601_v5 }
 0x119   : > { %2715 = vst [vmem:[%s3607_s21] sm:$0xff] %v510_v9  ;;  %2717 = vst [vmem:[%s3607_s21 + $0x10] sm:$0xff] %v581_v10 }
 0x11a   : > { %2716 = vst [vmem:[%s3607_s21 + $0x8] sm:$0xff] %v512_v0  ;;  %2718 = vst [vmem:[%s3607_s21 + $0x18] sm:$0xff] %v583_v13  ;;  %v651_v8 = vpop.f32.mrb[2].mxu0  ;;  %v722_v14 = vpop.f32.mrb[2].mxu1 }
 0x11b   : > { %v652_v15 = vadd.f32 %v651_v8, %v3601_v5  ;;  %v723_v16 = vadd.f32 %v722_v14, %v3601_v5  ;;  %v653_v17 = vpop.f32.mrb[3].mxu0  ;;  %v724_v18 = vpop.f32.mrb[3].mxu1 }
 0x11c   : > { %v654_v19 = vadd.f32 %v653_v17, %v3601_v5  ;;  %v725_v20 = vadd.f32 %v724_v18, %v3601_v5 }
 0x11d   : > { %2719 = vst [vmem:[%s3607_s21 + $0x20] sm:$0xff] %v652_v15  ;;  %2721 = vst [vmem:[%s3607_s21 + $0x30] sm:$0xff] %v723_v16 }
 0x11e   : > { %2720 = vst [vmem:[%s3607_s21 + $0x28] sm:$0xff] %v654_v19  ;;  %2722 = vst [vmem:[%s3607_s21 + $0x38] sm:$0xff] %v725_v20  ;;  %v793_v21 = vpop.f32.mrb[4].mxu0  ;;  %v864_v22 = vpop.f32.mrb[4].mxu1 }
 0x11f   : > { %v794_v23 = vadd.f32 %v793_v21, %v3601_v5  ;;  %v865_v24 = vadd.f32 %v864_v22, %v3601_v5  ;;  %v795_v25 = vpop.f32.mrb[5].mxu0  ;;  %v866_v26 = vpop.f32.mrb[5].mxu1 }
 0x120   : > { %v796_v27 = vadd.f32 %v795_v25, %v3601_v5  ;;  %v867_v28 = vadd.f32 %v866_v26, %v3601_v5 }
 0x121   : > { %2723 = vst [vmem:[%s3607_s21 + $0x40] sm:$0xff] %v794_v23  ;;  %2725 = vst [vmem:[%s3607_s21 + $0x50] sm:$0xff] %v865_v24 }
 0x122   : > { %2724 = vst [vmem:[%s3607_s21 + $0x48] sm:$0xff] %v796_v27  ;;  %2726 = vst [vmem:[%s3607_s21 + $0x58] sm:$0xff] %v867_v28  ;;  %v935_v29 = vpop.f32.mrb[6].mxu0  ;;  %v1006_v30 = vpop.f32.mrb[6].mxu1 }
 0x123   : > { %v936_v31 = vadd.f32 %v935_v29, %v3601_v5  ;;  %v1007_v32 = vadd.f32 %v1006_v30, %v3601_v5  ;;  %v937_v33 = vpop.f32.mrb[7].mxu0  ;;  %v1008_v34 = vpop.f32.mrb[7].mxu1 }
 0x124   : > { %v938_v35 = vadd.f32 %v937_v33, %v3601_v5  ;;  %v1009_v36 = vadd.f32 %v1008_v34, %v3601_v5 }
 0x125   : > { %2727 = vst [vmem:[%s3607_s21 + $0x60] sm:$0xff] %v936_v31  ;;  %2729 = vst [vmem:[%s3607_s21 + $0x70] sm:$0xff] %v1007_v32 }
 0x126   : > { %2728 = vst [vmem:[%s3607_s21 + $0x68] sm:$0xff] %v938_v35  ;;  %2730 = vst [vmem:[%s3607_s21 + $0x78] sm:$0xff] %v1009_v36  ;;  %v1077_v37 = vpop.f32.mrb[8].mxu0  ;;  %v1148_v38 = vpop.f32.mrb[8].mxu1 }
 0x127   : > { %v1078_v39 = vadd.f32 %v1077_v37, %v3601_v5  ;;  %v1149_v40 = vadd.f32 %v1148_v38, %v3601_v5  ;;  %v1079_v41 = vpop.f32.mrb[9].mxu0  ;;  %v1150_v42 = vpop.f32.mrb[9].mxu1 }
 0x128   : > { %v1080_v43 = vadd.f32 %v1079_v41, %v3601_v5  ;;  %v1151_v44 = vadd.f32 %v1150_v42, %v3601_v5 }
 0x129   : > { %2731 = vst [vmem:[%s3607_s21 + $0x80] sm:$0xff] %v1078_v39  ;;  %2733 = vst [vmem:[%s3607_s21 + $0x90] sm:$0xff] %v1149_v40 }
 0x12a   : > { %2732 = vst [vmem:[%s3607_s21 + $0x88] sm:$0xff] %v1080_v43  ;;  %2734 = vst [vmem:[%s3607_s21 + $0x98] sm:$0xff] %v1151_v44  ;;  %v1219_v45 = vpop.f32.mrb[10].mxu0  ;;  %v1290_v46 = vpop.f32.mrb[10].mxu1 }
 0x12b   : > { %v1220_v47 = vadd.f32 %v1219_v45, %v3601_v5  ;;  %v1291_v48 = vadd.f32 %v1290_v46, %v3601_v5  ;;  %v1221_v49 = vpop.f32.mrb[11].mxu0  ;;  %v1292_v50 = vpop.f32.mrb[11].mxu1 }
 0x12c   : > { %v1222_v51 = vadd.f32 %v1221_v49, %v3601_v5  ;;  %v1293_v52 = vadd.f32 %v1292_v50, %v3601_v5 }
 0x12d   : > { %2735 = vst [vmem:[%s3607_s21 + $0xa0] sm:$0xff] %v1220_v47  ;;  %2737 = vst [vmem:[%s3607_s21 + $0xb0] sm:$0xff] %v1291_v48 }
 0x12e   : > { %2736 = vst [vmem:[%s3607_s21 + $0xa8] sm:$0xff] %v1222_v51  ;;  %2738 = vst [vmem:[%s3607_s21 + $0xb8] sm:$0xff] %v1293_v52  ;;  %v1361_v53 = vpop.f32.mrb[12].mxu0  ;;  %v1432_v54 = vpop.f32.mrb[12].mxu1 }
 0x12f   : > { %v1362_v55 = vadd.f32 %v1361_v53, %v3601_v5  ;;  %v1433_v56 = vadd.f32 %v1432_v54, %v3601_v5  ;;  %v1363_v57 = vpop.f32.mrb[13].mxu0  ;;  %v1434_v58 = vpop.f32.mrb[13].mxu1 }
 0x130   : > { %v1364_v59 = vadd.f32 %v1363_v57, %v3601_v5  ;;  %v1435_v60 = vadd.f32 %v1434_v58, %v3601_v5 }
 0x131   : > { %2739 = vst [vmem:[%s3607_s21 + $0xc0] sm:$0xff] %v1362_v55  ;;  %2741 = vst [vmem:[%s3607_s21 + $0xd0] sm:$0xff] %v1433_v56 }
 0x132   : > { %2740 = vst [vmem:[%s3607_s21 + $0xc8] sm:$0xff] %v1364_v59  ;;  %2742 = vst [vmem:[%s3607_s21 + $0xd8] sm:$0xff] %v1435_v60  ;;  %v1503_v61 = vpop.f32.mrb[14].mxu0  ;;  %v1574_v62 = vpop.f32.mrb[14].mxu1 }
 0x133   : > { %v1504_v63 = vadd.f32 %v1503_v61, %v3601_v5  ;;  %v1575_v1 = vadd.f32 %v1574_v62, %v3601_v5  ;;  %v1505_v2 = vpop.f32.mrb[15].mxu0  ;;  %v1576_v3 = vpop.f32.mrb[15].mxu1 }
 0x134   : > { %v1506_v4 = vadd.f32 %v1505_v2, %v3601_v5  ;;  %v1577_v6 = vadd.f32 %v1576_v3, %v3601_v5 }
 0x135   : > { %2743 = vst [vmem:[%s3607_s21 + $0xe0] sm:$0xff] %v1504_v63  ;;  %2745 = vst [vmem:[%s3607_s21 + $0xf0] sm:$0xff] %v1575_v1 }
 0x136   : > { %2744 = vst [vmem:[%s3607_s21 + $0xe8] sm:$0xff] %v1506_v4  ;;  %2746 = vst [vmem:[%s3607_s21 + $0xf8] sm:$0xff] %v1577_v6  ;;  %v1645_v7 = vpop.f32.mrb[16].mxu0  ;;  %v1716_v9 = vpop.f32.mrb[16].mxu1 }
 0x137   : > { %v1646_v10 = vadd.f32 %v1645_v7, %v3601_v5  ;;  %v1717_v11 = vadd.f32 %v1716_v9, %v3601_v5  ;;  %v1647_v12 = vpop.f32.mrb[17].mxu0  ;;  %v1718_v0 = vpop.f32.mrb[17].mxu1 }
 0x138   : > { %v1648_v13 = vadd.f32 %v1647_v12, %v3601_v5  ;;  %v1719_v8 = vadd.f32 %v1718_v0, %v3601_v5 }
 0x139   : > { %2747 = vst [vmem:[%s3607_s21 + $0x100] sm:$0xff] %v1646_v10  ;;  %2749 = vst [vmem:[%s3607_s21 + $0x110] sm:$0xff] %v1717_v11 }
 0x13a   : > { %2748 = vst [vmem:[%s3607_s21 + $0x108] sm:$0xff] %v1648_v13  ;;  %2750 = vst [vmem:[%s3607_s21 + $0x118] sm:$0xff] %v1719_v8  ;;  %v1787_v14 = vpop.f32.mrb[18].mxu0  ;;  %v1858_v15 = vpop.f32.mrb[18].mxu1 }
 0x13b   : > { %v1788_v16 = vadd.f32 %v1787_v14, %v3601_v5  ;;  %v1859_v17 = vadd.f32 %v1858_v15, %v3601_v5  ;;  %v1789_v18 = vpop.f32.mrb[19].mxu0  ;;  %v1860_v19 = vpop.f32.mrb[19].mxu1 }
 0x13c   : > { %v1790_v20 = vadd.f32 %v1789_v18, %v3601_v5  ;;  %v1861_v21 = vadd.f32 %v1860_v19, %v3601_v5 }
 0x13d   : > { %2751 = vst [vmem:[%s3607_s21 + $0x120] sm:$0xff] %v1788_v16  ;;  %2753 = vst [vmem:[%s3607_s21 + $0x130] sm:$0xff] %v1859_v17 }
 0x13e   : > { %2752 = vst [vmem:[%s3607_s21 + $0x128] sm:$0xff] %v1790_v20  ;;  %2754 = vst [vmem:[%s3607_s21 + $0x138] sm:$0xff] %v1861_v21  ;;  %v1929_v22 = vpop.f32.mrb[20].mxu0  ;;  %v2000_v23 = vpop.f32.mrb[20].mxu1 }
 0x13f   : > { %v1930_v24 = vadd.f32 %v1929_v22, %v3601_v5  ;;  %v2001_v25 = vadd.f32 %v2000_v23, %v3601_v5  ;;  %v1931_v26 = vpop.f32.mrb[21].mxu0  ;;  %v2002_v27 = vpop.f32.mrb[21].mxu1 }
 0x140   : > { %v1932_v28 = vadd.f32 %v1931_v26, %v3601_v5  ;;  %v2003_v29 = vadd.f32 %v2002_v27, %v3601_v5 }
 0x141   : > { %2755 = vst [vmem:[%s3607_s21 + $0x140] sm:$0xff] %v1930_v24  ;;  %2757 = vst [vmem:[%s3607_s21 + $0x150] sm:$0xff] %v2001_v25 }
 0x142   : > { %2756 = vst [vmem:[%s3607_s21 + $0x148] sm:$0xff] %v1932_v28  ;;  %2758 = vst [vmem:[%s3607_s21 + $0x158] sm:$0xff] %v2003_v29  ;;  %v2071_v30 = vpop.f32.mrb[22].mxu0  ;;  %v2142_v31 = vpop.f32.mrb[22].mxu1 }
 0x143   : > { %v2072_v32 = vadd.f32 %v2071_v30, %v3601_v5  ;;  %v2143_v33 = vadd.f32 %v2142_v31, %v3601_v5  ;;  %v2073_v34 = vpop.f32.mrb[23].mxu0  ;;  %v2144_v35 = vpop.f32.mrb[23].mxu1 }
 0x144   : > { %v2074_v36 = vadd.f32 %v2073_v34, %v3601_v5  ;;  %v2145_v37 = vadd.f32 %v2144_v35, %v3601_v5 }
 0x145   : > { %2759 = vst [vmem:[%s3607_s21 + $0x160] sm:$0xff] %v2072_v32  ;;  %2761 = vst [vmem:[%s3607_s21 + $0x170] sm:$0xff] %v2143_v33 }
 0x146   : > { %2760 = vst [vmem:[%s3607_s21 + $0x168] sm:$0xff] %v2074_v36  ;;  %2762 = vst [vmem:[%s3607_s21 + $0x178] sm:$0xff] %v2145_v37  ;;  %v2213_v38 = vpop.f32.mrb[24].mxu0  ;;  %v2284_v39 = vpop.f32.mrb[24].mxu1 }
 0x147   : > { %v2214_v40 = vadd.f32 %v2213_v38, %v3601_v5  ;;  %v2285_v41 = vadd.f32 %v2284_v39, %v3601_v5  ;;  %v2215_v42 = vpop.f32.mrb[25].mxu0  ;;  %v2286_v43 = vpop.f32.mrb[25].mxu1 }
 0x148   : > { %v2216_v44 = vadd.f32 %v2215_v42, %v3601_v5  ;;  %v2287_v45 = vadd.f32 %v2286_v43, %v3601_v5 }
 0x149   : > { %2763 = vst [vmem:[%s3607_s21 + $0x180] sm:$0xff] %v2214_v40  ;;  %2765 = vst [vmem:[%s3607_s21 + $0x190] sm:$0xff] %v2285_v41 }
 0x14a   : > { %2764 = vst [vmem:[%s3607_s21 + $0x188] sm:$0xff] %v2216_v44  ;;  %2766 = vst [vmem:[%s3607_s21 + $0x198] sm:$0xff] %v2287_v45  ;;  %v2355_v46 = vpop.f32.mrb[26].mxu0  ;;  %v2426_v47 = vpop.f32.mrb[26].mxu1 }
 0x14b   : > { %v2356_v48 = vadd.f32 %v2355_v46, %v3601_v5  ;;  %v2427_v49 = vadd.f32 %v2426_v47, %v3601_v5  ;;  %v2357_v50 = vpop.f32.mrb[27].mxu0  ;;  %v2428_v51 = vpop.f32.mrb[27].mxu1 }
 0x14c   : > { %v2358_v52 = vadd.f32 %v2357_v50, %v3601_v5  ;;  %v2429_v53 = vadd.f32 %v2428_v51, %v3601_v5 }
 0x14d   : > { %2767 = vst [vmem:[%s3607_s21 + $0x1a0] sm:$0xff] %v2356_v48  ;;  %2769 = vst [vmem:[%s3607_s21 + $0x1b0] sm:$0xff] %v2427_v49 }
 0x14e   : > { %2768 = vst [vmem:[%s3607_s21 + $0x1a8] sm:$0xff] %v2358_v52  ;;  %2770 = vst [vmem:[%s3607_s21 + $0x1b8] sm:$0xff] %v2429_v53  ;;  %v2497_v54 = vpop.f32.mrb[28].mxu0  ;;  %v2568_v55 = vpop.f32.mrb[28].mxu1 }
 0x14f   : > { %v2498_v56 = vadd.f32 %v2497_v54, %v3601_v5  ;;  %v2569_v57 = vadd.f32 %v2568_v55, %v3601_v5  ;;  %v2499_v58 = vpop.f32.mrb[29].mxu0  ;;  %v2570_v59 = vpop.f32.mrb[29].mxu1 }
 0x150   : > { %v2500_v60 = vadd.f32 %v2499_v58, %v3601_v5  ;;  %v2571_v61 = vadd.f32 %v2570_v59, %v3601_v5 }
 0x151   : > { %2771 = vst [vmem:[%s3607_s21 + $0x1c0] sm:$0xff] %v2498_v56  ;;  %2773 = vst [vmem:[%s3607_s21 + $0x1d0] sm:$0xff] %v2569_v57 }
 0x152   : > { %2772 = vst [vmem:[%s3607_s21 + $0x1c8] sm:$0xff] %v2500_v60  ;;  %2774 = vst [vmem:[%s3607_s21 + $0x1d8] sm:$0xff] %v2571_v61  ;;  %v2639_v62 = vpop.f32.mrb[30].mxu0  ;;  %v2710_v63 = vpop.f32.mrb[30].mxu1 }
 0x153   : > { %v2640_v1 = vadd.f32 %v2639_v62, %v3601_v5  ;;  %v2711_v2 = vadd.f32 %v2710_v63, %v3601_v5  ;;  %v2641_v3 = vpop.f32.mrb[31].mxu0  ;;  %v2712_v4 = vpop.f32.mrb[31].mxu1 }
 0x154   : > { %v2642_v6 = vadd.f32 %v2641_v3, %v3601_v5  ;;  %v2713_v7 = vadd.f32 %v2712_v4, %v3601_v5 }
 0x155   : > { %2775 = vst [vmem:[%s3607_s21 + $0x1e0] sm:$0xff] %v2640_v1  ;;  %2777 = vst [vmem:[%s3607_s21 + $0x1f0] sm:$0xff] %v2711_v2 }
 0x156   : > { %2776 = vst [vmem:[%s3607_s21 + $0x1e8] sm:$0xff] %v2642_v6  ;;  %2778 = vst [vmem:[%s3607_s21 + $0x1f8] sm:$0xff] %v2713_v7 }
 0x157   : > { %3152 = shalt.err (!%p3149_p5)
}
 0x158   : > { %s3153_s8 = scalar_lea.hbm %s3735_s10, 8192  ;;  %s3157_s5 = scalar_lea.hbm %s3796_s3, 32768 }
 0x159   : > { %p3154_p7 = scmp.ne.s32.totalorder %s3735_s10, %s3153_s8  ;;  %p3158_p1 = scmp.lt.u32.totalorder %s3735_s10, %s3796_s3 }
 0x15a   : > { %p3159_p2 = scmp.lt.u32.totalorder %s3157_s5, %s3153_s8  ;;  %p3161_p8 = scmp.lt.u32.totalorder %s3153_s8, %s3735_s10 }
 0x15b   : > { %p3155_p10 = pnand %p3154_p7, %p3805_p9 }
 0x15c   : > { %p3160_p3 = por %p3159_p2, %p3158_p1 }
 0x15d   : > { %p3156_p11 = pneg %p3155_p10 }
 0x15e   : > { %p3162_p12 = por %p3161_p8, %p3160_p3 }
 0x160   : > { %p3163_p0 = pnand %p3162_p12, %p3156_p11 }
 0x162   : > { %3166 = shalt.err (!%p3163_p0)
}
 0x163   : > { %2998 = dma.vmem_to_hbm [thread:$0]  (%p3805_p9), %s3737_s16, 8192, %s3735_s10, %s2780_s20  }
 0x164 PF: > { %p3009_p6 = scmp.ge.s32.totalorder %s3237_s19, 2  ;;  %s2808_s15 = sand.u32 1, %s3209_s12  }
 0x165   : > { %p3806_p13 = scmp.ne.s32.totalorder %s3801_s4, 0  ;;  %s2809_s26 = scalar_lea.sflag [#allocation4], %s2808_s15 }
 0x167   : > { %p3005_p4 = pnand %p3009_p6, %p3806_p13 }
 0x169   : > { %3204 = dma.done.wait (!%p3005_p4), %s2809_s26, 8192  }
 0x16a   : > { %3206 = vsyncadd (!%p3005_p4), %s2809_s26, 4294959104  ;;  %s19_s19 = sadd.s32 1, %s3237_s19   ;;  %s3807_s12 = smov %s3213_s13 }
 0x16b   : > { %p16_p5 = scmp.ge.s32.totalorder %s19_s19, 6   ;;  %s3808_s13 = smov %s3217_s14 }
 0x16c   : > { %s3809_s14 = smov %s3341_s6  ;;  %s3810_s15 = smov %s3229_s17 }
 0x16d   : > { %s3811_s16 = smov %s3233_s18  ;;  %s3812_s17 = smov %s3815_s22 }
 0x16e   : > { %s3813_s18 = smov %s3819_s23  ;;  %18 = sbr.rel (!%p16_p5) target bundleno = 7 (0x7), region = 77 }
 0x175   :  { %2814 = vsyncpa [#allocation3], 1 }
 0x176   :  { %2816 = vsyncpa [#allocation3 + $0x1], 1 }
 0x177   :  { %2817 = vsyncpa [#allocation4], 1 }
 0x178   :  { %2819 = vsyncpa [#allocation4 + $0x1], 1 }

</bundles_post_ra>
